<compile_context>
chip_gen: v7x
topology: tpu7x:2x2x1
jax: 0.10.0
libtpu: 0.0.40
codegen_flags: <defaults>
</compile_context>

<pallas_src>
import functools

import jax
import jax.numpy as jnp
import numpy as np
from jax.experimental import pallas as pl
from jax.experimental.pallas import tpu as pltpu


def _round_up(n, m):
    return ((n + m - 1) // m) * m


# ----------------------------------------------------------------------------
# Kernel: the whole FFN in one invocation.
#   x_ref       : (B_pad, W_in)                padded, lane/sublane-dense
#   w_in_ref    : (W_in, W)                    pre-transposed, zero-padded
#   w_stack_ref : (num_hidden + 1, W, W)       hidden layers then final layer
#   b_stack_ref : (num_hidden + 2, B_pad, W)   f32, pre-broadcast biases
#   out_ref     : (B_pad, W)                   f32, lane-dense padded output
# ----------------------------------------------------------------------------
def _ffn_kernel(x_ref, w_in_ref, w_stack_ref, b_stack_ref, out_ref, *, num_hidden):
    mm_dtype = w_in_ref.dtype

    # input layer + ReLU  (dropout = identity in eval mode)
    y = jnp.dot(x_ref[...], w_in_ref[...], preferred_element_type=jnp.float32)
    y = jnp.maximum(y + b_stack_ref[0], 0.0)          # f32 epilogue (v5e-safe)

    # hidden layers + ReLU (num_hidden is static -> unrolled at trace time)
    for i in range(num_hidden):
        y = jnp.dot(y.astype(mm_dtype), w_stack_ref[i],
                    preferred_element_type=jnp.float32)
        y = jnp.maximum(y + b_stack_ref[i + 1], 0.0)

    # final layer (lane-dense padded output -> unmasked vst)
    out = jnp.dot(y.astype(mm_dtype), w_stack_ref[num_hidden],
                  preferred_element_type=jnp.float32)
    out_ref[...] = (out + b_stack_ref[num_hidden + 1]).astype(out_ref.dtype)


# ----------------------------------------------------------------------------
# One-time parameter prep.  Call ONCE per parameter set (not per forward).
# ----------------------------------------------------------------------------
def prepare_ffn_params(params, *, batch, output_size, matmul_dtype=jnp.float32,
                       lane=128, sublane=8):
    """Transpose/pad/stack the FFN parameters into 3 dense VMEM-friendly buffers.

    matmul_dtype=jnp.bfloat16 is the recommended setting on v6e/v7x (bf16 MXU
    operands, f32 accumulation); float32 keeps exact parity and is correct
    everywhere (incl. v5e).
    """
    w_in, b_in = params["w_in"], params["b_in"]
    hidden = params["hidden"]
    w_out, b_out = params["w_out"], params["b_out"]

    H, D_in = w_in.shape
    O = w_out.shape[0]
    num_hidden = len(hidden)

    W = _round_up(max(H, O), lane)          # common padded width of all layers
    W_in = _round_up(D_in, lane)            # padded flattened-input width
    B_pad = _round_up(max(batch, 1), sublane)

    def pad2(a, rows, cols):
        out = jnp.zeros((rows, cols), matmul_dtype)
        return out.at[: a.shape[0], : a.shape[1]].set(a.astype(matmul_dtype))

    w_in_p = pad2(w_in.T, W_in, W)                                  # (W_in, W)
    w_stack = jnp.stack([pad2(w.T, W, W) for (w, _) in hidden]
                        + [pad2(w_out.T, W, W)], axis=0)            # (nh+1, W, W)

    def pad_bias(b):
        v = jnp.zeros((W,), jnp.float32).at[: b.shape[0]].set(b.astype(jnp.float32))
        return jnp.broadcast_to(v, (B_pad, W))
    b_stack = jnp.stack([pad_bias(b_in)] + [pad_bias(b) for (_, b) in hidden]
                        + [pad_bias(b_out)], axis=0)                # (nh+2, B_pad, W)

    return {
        "w_in": w_in_p, "w_stack": w_stack, "b_stack": b_stack,
        "output_size": int(output_size),
    }


# ----------------------------------------------------------------------------
# Jitted per-call forward: flatten/pad -> single pallas_call -> slice.
# ----------------------------------------------------------------------------
@functools.partial(jax.jit, static_argnames=("output_size",))
def _ffn_forward_impl(x, w_in, w_stack, b_stack, *, output_size):
    B = x.shape[0]
    x_flat = x.reshape(B, -1)                       # torch.flatten(x, start_dim=1)
    W_in, W = w_in.shape
    B_pad = b_stack.shape[1]
    num_hidden = w_stack.shape[0] - 1

    # pad to sublane-dense batch / lane-dense feature width (zeros are inert)
    x_pad = jnp.zeros((B_pad, W_in), w_in.dtype)
    x_pad = x_pad.at[:B, : x_flat.shape[1]].set(x_flat.astype(w_in.dtype))

    vmem = pl.BlockSpec(memory_space=pltpu.MemorySpace.VMEM)
    out_pad = pl.pallas_call(
        functools.partial(_ffn_kernel, num_hidden=num_hidden),
        out_shape=jax.ShapeDtypeStruct((B_pad, W), jnp.float32),
        in_specs=[vmem, vmem, vmem, vmem],
        out_specs=vmem,
        compiler_params=pltpu.CompilerParams(vmem_limit_bytes=32 * 1024 * 1024),
    )(x_pad, w_in, w_stack, b_stack)

    return out_pad[:B, :output_size]


def ffn_forward(x, prepped):
    """Equivalent of FFN.forward(x) in eval mode.  x: (B, seq_len, input_size)."""
    return _ffn_forward_impl(x, prepped["w_in"], prepped["w_stack"],
                             prepped["b_stack"], output_size=prepped["output_size"])


# ----------------------------------------------------------------------------
# Exact host-side (numpy float64) reference for the correctness check.
# ----------------------------------------------------------------------------
def ffn_forward_ref(x, params):
    y = np.asarray(x, np.float64).reshape(x.shape[0], -1)
    y = np.maximum(y @ np.asarray(params["w_in"], np.float64).T
                   + np.asarray(params["b_in"], np.float64), 0.0)
    for w, b in params["hidden"]:
        y = np.maximum(y @ np.asarray(w, np.float64).T
                       + np.asarray(b, np.float64), 0.0)
    return (y @ np.asarray(params["w_out"], np.float64).T
            + np.asarray(params["b_out"], np.float64))


# ----------------------------------------------------------------------------
# Parameter init (PyTorch nn.Linear style: uniform(+-1/sqrt(fan_in))).
# Weights stored PyTorch-style (out_features, in_features); prep transposes.
# ----------------------------------------------------------------------------
def init_params(key, *, input_size, hidden_size, output_size, num_layers):
    def linear(k, out_f, in_f):
        bound = 1.0 / (in_f ** 0.5)
        kw, kb = jax.random.split(k)
        w = jax.random.uniform(kw, (out_f, in_f), jnp.float32, -bound, bound)
        b = jax.random.uniform(kb, (out_f,), jnp.float32, -bound, bound)
        return w, b

    key, k_in = jax.random.split(key)
    w_in, b_in = linear(k_in, hidden_size, input_size)
    hidden = []
    for _ in range(num_layers):
        key, kh = jax.random.split(key)
        hidden.append(linear(kh, hidden_size, hidden_size))
    key, k_out = jax.random.split(key)
    w_out, b_out = linear(k_out, output_size, hidden_size)
    return {"w_in": w_in, "b_in": b_in, "hidden": hidden,
            "w_out": w_out, "b_out": b_out}


# ----------------------------------------------------------------------------
if __name__ == "__main__":
    # hyperparameters / constants analogue (matching the PyTorch module)
    input_size_per_step = 6        # constants['input size']
    sequence_length = 8            # hyperparameters['sequence length']
    hidden_size = 32               # hyperparameters['hidden size']
    output_size = 3                # constants['output size']
    num_layers = 2                 # hyperparameters['number of layers']
    batch = 2                      # hyperparameters['batch size']

    flat_input_size = input_size_per_step * sequence_length  # FFN.input_size

    key = jax.random.PRNGKey(0)
    key, kx = jax.random.split(key)
    x = jax.random.normal(kx, (batch, sequence_length, input_size_per_step),
                          jnp.float32)

    params = init_params(key, input_size=flat_input_size,
                         hidden_size=hidden_size, output_size=output_size,
                         num_layers=num_layers)

    # One-time prep (per parameter set), then the jitted fused forward.
    # On v6e/v7x you may pass matmul_dtype=jnp.bfloat16 here for bf16 MXU
    # operands; float32 is kept for the exact correctness check below.
    prepped = prepare_ffn_params(params, batch=batch, output_size=output_size)
    prepped = jax.tree_util.tree_map(
        lambda a: jax.block_until_ready(a) if isinstance(a, jax.Array) else a,
        prepped)

    out = ffn_forward(x, prepped)
    out = jax.block_until_ready(out)

    # Sanity check against the exact float64 host reference.  Tolerance allows
    # for a possible reduced-precision (bf16-pass) f32 matmul path on TPU.
    out_ref = ffn_forward_ref(np.asarray(x), params)
    assert out.shape == (batch, output_size)
    assert np.allclose(np.asarray(out), out_ref, atol=5e-3, rtol=5e-3)

    print("KERNEL_OK")
</pallas_src>

<mosaic_0001>
module attributes {stable_mosaic.version = 11 : i64} {
  func.func @_ffn_kernel(%arg0: memref<8x128xf32, #tpu.memory_space<vmem>>, %arg1: memref<128x128xf32, #tpu.memory_space<vmem>>, %arg2: memref<3x128x128xf32, #tpu.memory_space<vmem>>, %arg3: memref<4x8x128xf32, #tpu.memory_space<vmem>>, %arg4: memref<8x128xf32, #tpu.memory_space<vmem>>) attributes {dimension_semantics = [], scalar_prefetch = 0 : i64, scratch_operands = 0 : i64, tpu.core_type = #tpu.core_type<tc>} {
    %c0 = arith.constant 0 : index
    %c0_0 = arith.constant 0 : index
    %0 = vector.load %arg0[%c0, %c0_0] : memref<8x128xf32, #tpu.memory_space<vmem>>, vector<8x128xf32>
    %c0_1 = arith.constant 0 : index
    %c0_2 = arith.constant 0 : index
    %1 = vector.load %arg1[%c0_1, %c0_2] : memref<128x128xf32, #tpu.memory_space<vmem>>, vector<128x128xf32>
    %cst = arith.constant dense<0.000000e+00> : vector<8x128xf32>
    %2 = tpu.matmul %0, %1, %cst {dimension_numbers = #tpu.dot_dimension_numbers<[1], [0], [0], [1], [0, 0, 1, 1], [], []>} : vector<8x128xf32>, vector<128x128xf32>, vector<8x128xf32> -> vector<8x128xf32>
    %c0_3 = arith.constant 0 : index
    %c0_4 = arith.constant 0 : index
    %c0_5 = arith.constant 0 : index
    %3 = vector.load %arg3[%c0_3, %c0_4, %c0_5] : memref<4x8x128xf32, #tpu.memory_space<vmem>>, vector<1x8x128xf32>
    %4 = vector.shape_cast %3 : vector<1x8x128xf32> to vector<8x128xf32>
    %5 = arith.addf %2, %4 : vector<8x128xf32>
    %cst_6 = arith.constant 0.000000e+00 : f32
    %6 = vector.broadcast %cst_6 : f32 to vector<8x128xf32>
    %7 = arith.maximumf %5, %6 : vector<8x128xf32>
    %c0_7 = arith.constant 0 : index
    %c0_8 = arith.constant 0 : index
    %c0_9 = arith.constant 0 : index
    %8 = vector.load %arg2[%c0_7, %c0_8, %c0_9] : memref<3x128x128xf32, #tpu.memory_space<vmem>>, vector<1x128x128xf32>
    %9 = vector.shape_cast %8 : vector<1x128x128xf32> to vector<128x128xf32>
    %cst_10 = arith.constant dense<0.000000e+00> : vector<8x128xf32>
    %10 = tpu.matmul %7, %9, %cst_10 {dimension_numbers = #tpu.dot_dimension_numbers<[1], [0], [0], [1], [0, 0, 1, 1], [], []>} : vector<8x128xf32>, vector<128x128xf32>, vector<8x128xf32> -> vector<8x128xf32>
    %c1 = arith.constant 1 : index
    %c0_11 = arith.constant 0 : index
    %c0_12 = arith.constant 0 : index
    %11 = vector.load %arg3[%c1, %c0_11, %c0_12] : memref<4x8x128xf32, #tpu.memory_space<vmem>>, vector<1x8x128xf32>
    %12 = vector.shape_cast %11 : vector<1x8x128xf32> to vector<8x128xf32>
    %13 = arith.addf %10, %12 : vector<8x128xf32>
    %cst_13 = arith.constant 0.000000e+00 : f32
    %14 = vector.broadcast %cst_13 : f32 to vector<8x128xf32>
    %15 = arith.maximumf %13, %14 : vector<8x128xf32>
    %c1_14 = arith.constant 1 : index
    %c0_15 = arith.constant 0 : index
    %c0_16 = arith.constant 0 : index
    %16 = vector.load %arg2[%c1_14, %c0_15, %c0_16] : memref<3x128x128xf32, #tpu.memory_space<vmem>>, vector<1x128x128xf32>
    %17 = vector.shape_cast %16 : vector<1x128x128xf32> to vector<128x128xf32>
    %cst_17 = arith.constant dense<0.000000e+00> : vector<8x128xf32>
    %18 = tpu.matmul %15, %17, %cst_17 {dimension_numbers = #tpu.dot_dimension_numbers<[1], [0], [0], [1], [0, 0, 1, 1], [], []>} : vector<8x128xf32>, vector<128x128xf32>, vector<8x128xf32> -> vector<8x128xf32>
    %c2 = arith.constant 2 : index
    %c0_18 = arith.constant 0 : index
    %c0_19 = arith.constant 0 : index
    %19 = vector.load %arg3[%c2, %c0_18, %c0_19] : memref<4x8x128xf32, #tpu.memory_space<vmem>>, vector<1x8x128xf32>
    %20 = vector.shape_cast %19 : vector<1x8x128xf32> to vector<8x128xf32>
    %21 = arith.addf %18, %20 : vector<8x128xf32>
    %cst_20 = arith.constant 0.000000e+00 : f32
    %22 = vector.broadcast %cst_20 : f32 to vector<8x128xf32>
    %23 = arith.maximumf %21, %22 : vector<8x128xf32>
    %c2_21 = arith.constant 2 : index
    %c0_22 = arith.constant 0 : index
    %c0_23 = arith.constant 0 : index
    %24 = vector.load %arg2[%c2_21, %c0_22, %c0_23] : memref<3x128x128xf32, #tpu.memory_space<vmem>>, vector<1x128x128xf32>
    %25 = vector.shape_cast %24 : vector<1x128x128xf32> to vector<128x128xf32>
    %cst_24 = arith.constant dense<0.000000e+00> : vector<8x128xf32>
    %26 = tpu.matmul %23, %25, %cst_24 {dimension_numbers = #tpu.dot_dimension_numbers<[1], [0], [0], [1], [0, 0, 1, 1], [], []>} : vector<8x128xf32>, vector<128x128xf32>, vector<8x128xf32> -> vector<8x128xf32>
    %c3 = arith.constant 3 : index
    %c0_25 = arith.constant 0 : index
    %c0_26 = arith.constant 0 : index
    %27 = vector.load %arg3[%c3, %c0_25, %c0_26] : memref<4x8x128xf32, #tpu.memory_space<vmem>>, vector<1x8x128xf32>
    %28 = vector.shape_cast %27 : vector<1x8x128xf32> to vector<8x128xf32>
    %29 = arith.addf %26, %28 : vector<8x128xf32>
    %c0_27 = arith.constant 0 : index
    %c0_28 = arith.constant 0 : index
    %30 = vector.load %arg4[%c0_27, %c0_28] : memref<8x128xf32, #tpu.memory_space<vmem>>, vector<8x128xf32>
    tpu.vector_store %arg4[%c0_27, %c0_28], %29 {strides = array<i32>} : memref<8x128xf32, #tpu.memory_space<vmem>>, vector<8x128xf32>,
    return
  }
}

</mosaic_0001>

<bundles_post_ra>
// kernel: _ffn_forward_impl.1
= control target key start
LH: loop header
LB: loop body
LE: loop exit
PB: predicated region body
PF: predicated region fallthrough
CT: control target
= control target key end

     0   :  { %9 = vsyncpa [#allocation3], 0  ;;  %s885_s0 = inlined_call_operand.vmem [shape: f32[8,128], index: 0, kind: input, shape index: {}]   ;;  %s886_s1 = inlined_call_operand.hbm [shape: f32[128,128], index: 1, kind: input, shape index: {}]   ;;  %s887_s2 = inlined_call_operand.hbm [shape: f32[3,128,128], index: 2, kind: input, shape index: {}]   ;;  %s888_s3 = inlined_call_operand.vmem [shape: f32[4,8,128], index: 3, kind: input, shape index: {}]   ;;  %s889_s4 = inlined_call_operand.vmem [shape: f32[8,128], index: 4, kind: output, shape index: {}]  }
   0x1   :  { %10 = vsyncpa [#allocation5], 0  ;;  %s771_s15 = smov [#allocation2]   ;;  %s723_s19 = scalar_lea.hbm %s886_s1, 2048 }
   0x2   :  { %s18_s16 = sshll.u32 %s771_s15, 4  ;;  %p724_p0 = scmp.ne.s32.totalorder %s886_s1, %s723_s19  ;;  %s19_s16 = int_to_ptr.vmem [resolvable:$true] %s18_s16 }
   0x3   :  { %p727_p1 = scmp.lt.u32.totalorder %s723_s19, %s886_s1 }
   0x5   :  { %p729_p2 = pnand %p727_p1, %p724_p0 }
   0x7   :  { %732 = shalt.err (!%p729_p2)
}
   0x8   :  { %s733_s24 = scalar_lea.vmem %s19_s16, 2048  ;;  %p738_p4 = scmp.lt.s32.totalorder %s19_s16, %s19_s16 }
   0x9   :  { %p734_p3 = scmp.ne.s32.totalorder %s19_s16, %s733_s24  ;;  %p739_p5 = scmp.lt.s32.totalorder %s733_s24, %s733_s24 }
   0xb   :  { %p740_p6 = por %p739_p5, %p738_p4 }
   0xd   :  { %p741_p7 = pnand %p740_p6, %p734_p3 }
   0xf   :  { %744 = shalt.err (!%p741_p7)
}
  0x10   :  { %s772_s25 = smov 128   ;;  %s773_s26 = smov 8  }
  0x11   :  { %24 = dma.hbm_to_vmem [thread:$0]  %s886_s1, 2048, %s19_s16, [#allocation3], %s772_s25, %s772_s25, %s773_s26  }
  0x12   :  { %s774_s29 = smov [#allocation4]   ;;  %s745_s7 = scalar_lea.hbm %s887_s2, 6144 }
  0x13   :  { %s30_s30 = sshll.u32 %s774_s29, 4  ;;  %p746_p8 = scmp.ne.s32.totalorder %s887_s2, %s745_s7  ;;  %s31_s30 = int_to_ptr.vmem [resolvable:$true] %s30_s30 }
  0x14   :  { %p749_p9 = scmp.lt.u32.totalorder %s745_s7, %s887_s2 }
  0x16   :  { %p751_p10 = pnand %p749_p9, %p746_p8 }
  0x18   :  { %754 = shalt.err (!%p751_p10)
}
  0x19   :  { %s755_s12 = scalar_lea.vmem %s31_s30, 6144  ;;  %p760_p12 = scmp.lt.s32.totalorder %s31_s30, %s31_s30 }
  0x1a   :  { %p756_p11 = scmp.ne.s32.totalorder %s31_s30, %s755_s12  ;;  %p761_p13 = scmp.lt.s32.totalorder %s755_s12, %s755_s12 }
  0x1c   :  { %p762_p0 = por %p761_p13, %p760_p12 }
  0x1e   :  { %p763_p1 = pnand %p762_p0, %p756_p11 }
  0x20   :  { %766 = shalt.err (!%p763_p1)
}
  0x21   :  { %36 = dma.hbm_to_vmem [thread:$0]  %s887_s2, 6144, %s31_s30, [#allocation5], %s772_s25, %s772_s25, %s773_s26  }
  0x22   :  { %767 = dma.done.wait [#allocation3], 2048  }
  0x23   :  { %768 = vsyncadd [#allocation3], 4294965248 }
  0x24   :  { %769 = dma.done.wait [#allocation5], 6144  }
  0x25   :  { %770 = vsyncadd [#allocation5], 4294961152  ;;  %v775_v0 = vmov 0.0|0.0   ;;  %vm776_vm0 = vmmov 0   ;;  %v777_v1 = vmov 0.0   ;;  %v46_v2 = vld [vmem:[#allocation2] sm:$0xff] }
  0x26   :  { %620 = vmatprep.subr.bf16.mxu0 %v775_v0  ;;  %512 = vmatprep.mubr.msk.f32.mxu0 %vm776_vm0, %v777_v1  ;;  %v47_v3 = vld [vmem:[#allocation2 + $0x8] sm:$0xff]  ;;  %v48_v4 = vld [vmem:[#allocation2 + $0x10] sm:$0xff]  ;;  %v49_v6 = vld [vmem:[#allocation2 + $0x18] sm:$0xff] }
  0x27   :  { %644 = vmatprep.subr.bf16.mxu1 %v775_v0  ;;  %547 = vmatprep.mubr.msk.f32.mxu1 %vm776_vm0, %v777_v1  ;;  %v621_v5 = vpack.c.bf16 %v47_v3, %v46_v2  ;;  %v624_v7 = vpack.c.bf16 %v49_v6, %v48_v4  ;;  %v50_v8 = vld [vmem:[#allocation2 + $0x20] sm:$0xff]  ;;  %v51_v9 = vld [vmem:[#allocation2 + $0x28] sm:$0xff]  ;;  %v136_v12 = vld [vmem:[#allocation4 + $0x10] sm:$0xff] }
  0x28   :  { %v134_v10 = vld [vmem:[#allocation4] sm:$0xff]  ;;  %v135_v11 = vld [vmem:[#allocation4 + $0x8] sm:$0xff]  ;;  %v137_v13 = vld [vmem:[#allocation4 + $0x18] sm:$0xff]  ;;  %v627_v14 = vpack.c.bf16 %v51_v9, %v50_v8 }
  0x29   :  { %622 = vmatpush3.bf16.msra.mxu0 %v621_v5  ;;  %v645_v15 = vpack.c.bf16 %v135_v11, %v134_v10  ;;  %v52_v16 = vld [vmem:[#allocation2 + $0x30] sm:$0xff]  ;;  %v53_v17 = vld [vmem:[#allocation2 + $0x38] sm:$0xff]  ;;  %v648_v18 = vpack.c.bf16 %v137_v13, %v136_v12  ;;  %v138_v19 = vld [vmem:[#allocation4 + $0x20] sm:$0xff] }
  0x2a   :  { %623 = vmatprep.subr.bf16.mxu0 %v775_v0  ;;  %v139_v20 = vld [vmem:[#allocation4 + $0x28] sm:$0xff]  ;;  %v630_v21 = vpack.c.bf16 %v53_v17, %v52_v16  ;;  %v54_v22 = vld [vmem:[#allocation2 + $0x40] sm:$0xff]  ;;  %v140_v25 = vld [vmem:[#allocation4 + $0x30] sm:$0xff] }
  0x2b   :  { %646 = vmatpush3.bf16.msra.mxu1 %v645_v15  ;;  %v55_v23 = vld [vmem:[#allocation2 + $0x48] sm:$0xff]  ;;  %v651_v24 = vpack.c.bf16 %v139_v20, %v138_v19  ;;  %v141_v26 = vld [vmem:[#allocation4 + $0x38] sm:$0xff]  ;;  %v56_v28 = vld [vmem:[#allocation2 + $0x50] sm:$0xff] }
  0x2c   :  { %647 = vmatprep.subr.bf16.mxu1 %v775_v0  ;;  %v633_v27 = vpack.c.bf16 %v55_v23, %v54_v22  ;;  %v57_v29 = vld [vmem:[#allocation2 + $0x58] sm:$0xff]  ;;  %v654_v30 = vpack.c.bf16 %v141_v26, %v140_v25  ;;  %v142_v31 = vld [vmem:[#allocation4 + $0x40] sm:$0xff]  ;;  %v143_v32 = vld [vmem:[#allocation4 + $0x48] sm:$0xff] }
  0x2d   :  { %625 = vmatpush3.bf16.msra.mxu0 %v624_v7  ;;  %v636_v33 = vpack.c.bf16 %v57_v29, %v56_v28  ;;  %v58_v34 = vld [vmem:[#allocation2 + $0x60] sm:$0xff]  ;;  %v59_v35 = vld [vmem:[#allocation2 + $0x68] sm:$0xff]  ;;  %v657_v36 = vpack.c.bf16 %v143_v32, %v142_v31  ;;  %v144_v37 = vld [vmem:[#allocation4 + $0x50] sm:$0xff] }
  0x2e   :  { %626 = vmatprep.subr.bf16.mxu0 %v775_v0  ;;  %v145_v38 = vld [vmem:[#allocation4 + $0x58] sm:$0xff]  ;;  %v639_v39 = vpack.c.bf16 %v59_v35, %v58_v34  ;;  %v60_v40 = vld [vmem:[#allocation2 + $0x70] sm:$0xff]  ;;  %v146_v43 = vld [vmem:[#allocation4 + $0x60] sm:$0xff] }
  0x2f   :  { %649 = vmatpush3.bf16.msra.mxu1 %v648_v18  ;;  %v61_v41 = vld [vmem:[#allocation2 + $0x78] sm:$0xff]  ;;  %v660_v42 = vpack.c.bf16 %v145_v38, %v144_v37  ;;  %v147_v44 = vld [vmem:[#allocation4 + $0x68] sm:$0xff]  ;;  %v45_v47 = vld [vmem:[%s885_s0] sm:$0xff] }
  0x30   :  { %650 = vmatprep.subr.bf16.mxu1 %v775_v0  ;;  %v642_v45 = vpack.c.bf16 %v61_v41, %v60_v40  ;;  %v663_v46 = vpack.c.bf16 %v147_v44, %v146_v43  ;;  %v148_v48 = vld [vmem:[#allocation4 + $0x70] sm:$0xff]  ;;  %v149_v49 = vld [vmem:[#allocation4 + $0x78] sm:$0xff]  ;;  %v224_v51 = vld [vmem:[#allocation4 + $0x80] sm:$0xff] }
  0x31   :  { %628 = vmatpush3.bf16.msra.mxu0 %v627_v14  ;;  %v666_v50 = vpack.c.bf16 %v149_v49, %v148_v48  ;;  %v225_v52 = vld [vmem:[#allocation4 + $0x88] sm:$0xff]  ;;  %v226_v53 = vld [vmem:[#allocation4 + $0x90] sm:$0xff]  ;;  %v227_v55 = vld [vmem:[#allocation4 + $0x98] sm:$0xff] }
  0x32   :  { %629 = vmatprep.subr.bf16.mxu0 %v775_v0  ;;  %v669_v54 = vpack.c.bf16 %v225_v52, %v224_v51  ;;  %v672_v56 = vpack.c.bf16 %v227_v55, %v226_v53  ;;  %v228_v57 = vld [vmem:[#allocation4 + $0xa0] sm:$0xff]  ;;  %v229_v58 = vld [vmem:[#allocation4 + $0xa8] sm:$0xff]  ;;  %v230_v60 = vld [vmem:[#allocation4 + $0xb0] sm:$0xff] }
  0x33   :  { %652 = vmatpush3.bf16.msra.mxu1 %v651_v24  ;;  %v675_v59 = vpack.c.bf16 %v229_v58, %v228_v57  ;;  %v231_v61 = vld [vmem:[#allocation4 + $0xb8] sm:$0xff]  ;;  %v232_v63 = vld [vmem:[#allocation4 + $0xc0] sm:$0xff]  ;;  %v233_v2 = vld [vmem:[#allocation4 + $0xc8] sm:$0xff] }
  0x34   :  { %653 = vmatprep.subr.bf16.mxu1 %v775_v0  ;;  %v678_v62 = vpack.c.bf16 %v231_v61, %v230_v60  ;;  %v681_v3 = vpack.c.bf16 %v233_v2, %v232_v63  ;;  %v234_v4 = vld [vmem:[#allocation4 + $0xd0] sm:$0xff]  ;;  %v235_v5 = vld [vmem:[#allocation4 + $0xd8] sm:$0xff]  ;;  %v236_v7 = vld [vmem:[#allocation4 + $0xe0] sm:$0xff] }
  0x35   :  { %631 = vmatpush3.bf16.msra.mxu0 %v630_v21  ;;  %v684_v6 = vpack.c.bf16 %v235_v5, %v234_v4  ;;  %v237_v8 = vld [vmem:[#allocation4 + $0xe8] sm:$0xff]  ;;  %v62_v10 = vld [vmem:[%s888_s3] sm:$0xff]  ;;  %v238_v15 = vld [vmem:[#allocation4 + $0xf0] sm:$0xff] }
  0x36   :  { %632 = vmatprep.subr.bf16.mxu0 %v775_v0  ;;  %v687_v9 = vpack.c.bf16 %v237_v8, %v236_v7  ;;  %v239_v16 = vld [vmem:[#allocation4 + $0xf8] sm:$0xff]  ;;  %v314_v18 = vld [vmem:[#allocation4 + $0x100] sm:$0xff]  ;;  %v315_v19 = vld [vmem:[#allocation4 + $0x108] sm:$0xff] }
  0x37   :  { %655 = vmatpush3.bf16.msra.mxu1 %v654_v30  ;;  %v690_v17 = vpack.c.bf16 %v239_v16, %v238_v15  ;;  %v316_v20 = vld [vmem:[#allocation4 + $0x110] sm:$0xff]  ;;  %v693_v21 = vpack.c.bf16 %v315_v19, %v314_v18  ;;  %v317_v22 = vld [vmem:[#allocation4 + $0x118] sm:$0xff]  ;;  %v318_v24 = vld [vmem:[#allocation4 + $0x120] sm:$0xff] }
  0x38   :  { %656 = vmatprep.subr.bf16.mxu1 %v775_v0  ;;  %v696_v23 = vpack.c.bf16 %v317_v22, %v316_v20  ;;  %v319_v25 = vld [vmem:[#allocation4 + $0x128] sm:$0xff]  ;;  %v322_v29 = vld [vmem:[#allocation4 + $0x140] sm:$0xff]  ;;  %v324_v32 = vld [vmem:[#allocation4 + $0x150] sm:$0xff] }
  0x39   :  { %634 = vmatpush3.bf16.msra.mxu0 %v633_v27  ;;  %v699_v26 = vpack.c.bf16 %v319_v25, %v318_v24  ;;  %v321_v27 = vld [vmem:[#allocation4 + $0x138] sm:$0xff]  ;;  %v323_v30 = vld [vmem:[#allocation4 + $0x148] sm:$0xff]  ;;  %v326_v35 = vld [vmem:[#allocation4 + $0x160] sm:$0xff] }
  0x3a   :  { %635 = vmatprep.subr.bf16.mxu0 %v775_v0  ;;  %v705_v31 = vpack.c.bf16 %v323_v30, %v322_v29  ;;  %v409_v38 = vld [vmem:[%s888_s3 + $0x8] sm:$0xff]  ;;  %v328_v43 = vld [vmem:[#allocation4 + $0x170] sm:$0xff]  ;;  %v329_v44 = vld [vmem:[#allocation4 + $0x178] sm:$0xff] }
  0x3b   :  { %658 = vmatpush3.bf16.msra.mxu1 %v657_v36  ;;  %v327_v36 = vld [vmem:[#allocation4 + $0x168] sm:$0xff] }
  0x3c   :  { %659 = vmatprep.subr.bf16.mxu1 %v775_v0  ;;  %v711_v37 = vpack.c.bf16 %v327_v36, %v326_v35 }
  0x3d   :  { %637 = vmatpush3.bf16.msra.mxu0 %v636_v33  ;;  %v325_v33 = vld [vmem:[#allocation4 + $0x158] sm:$0xff] }
  0x3e   :  { %638 = vmatprep.subr.bf16.mxu0 %v775_v0  ;;  %v708_v34 = vpack.c.bf16 %v325_v33, %v324_v32 }
  0x3f   :  { %661 = vmatpush3.bf16.msra.mxu1 %v660_v42 }
  0x40   :  { %662 = vmatprep.subr.bf16.mxu1 %v775_v0 }
  0x41   :  { %640 = vmatpush3.bf16.msra.mxu0 %v639_v39 }
  0x42   :  { %641 = vmatprep.subr.bf16.mxu0 %v775_v0 }
  0x43   :  { %664 = vmatpush3.bf16.msra.mxu1 %v663_v46  ;;  %v410_v46 = vld [vmem:[%s888_s3 + $0x10] sm:$0xff] }
  0x44   :  { %665 = vmatprep.subr.bf16.mxu1 %v775_v0 }
  0x45   :  { %643 = vmatpush3.bf16.msra.mxu0 %v642_v45  ;;  %v714_v45 = vpack.c.bf16 %v329_v44, %v328_v43 }
  0x46   :  { %668 = vmatprep.subr.bf16.mxu0 %v775_v0 }
  0x47   :  { %667 = vmatpush3.bf16.msra.mxu1 %v666_v50  ;;  %v411_v50 = vld [vmem:[%s888_s3 + $0x18] sm:$0xff] }
  0x48   :  { %513 = vmatmul.mubr.f32.vlgmr.msra.gmra.mrb[0].mxu0 %v45_v47  ;;  %692 = vmatprep.subr.bf16.mxu1 %v775_v0 }
  0x49   :  { %582 = vmatprep.mubr.msk.f32.mxu0 %vm776_vm0, %v777_v1  ;;  %670 = vmatpush3.bf16.msra.mxu0 %v669_v54 }
  0x4a   :  { %671 = vmatprep.subr.bf16.mxu0 %v775_v0 }
  0x4d   :  { %673 = vmatpush3.bf16.msra.mxu0 %v672_v56 }
  0x4e   :  { %674 = vmatprep.subr.bf16.mxu0 %v775_v0 }
  0x51   :  { %676 = vmatpush3.bf16.msra.mxu0 %v675_v59 }
  0x52   :  { %677 = vmatprep.subr.bf16.mxu0 %v775_v0 }
  0x55   :  { %679 = vmatpush3.bf16.msra.mxu0 %v678_v62 }
  0x56   :  { %680 = vmatprep.subr.bf16.mxu0 %v775_v0 }
  0x59   :  { %682 = vmatpush3.bf16.msra.mxu0 %v681_v3 }
  0x5a   :  { %683 = vmatprep.subr.bf16.mxu0 %v775_v0 }
  0x5d   :  { %685 = vmatpush3.bf16.msra.mxu0 %v684_v6 }
  0x5e   :  { %686 = vmatprep.subr.bf16.mxu0 %v775_v0 }
  0x61   :  { %688 = vmatpush3.bf16.msra.mxu0 %v687_v9 }
  0x62   :  { %689 = vmatprep.subr.bf16.mxu0 %v775_v0 }
  0x65   :  { %691 = vmatpush3.bf16.msra.mxu0 %v690_v17 }
 0x11b   :  { %v129_v11 = vpop.f32.mrb[0].mxu0 }
 0x11c   :  { %v130_v12 = vadd.f32 %v129_v11, %v62_v10  ;;  %v514_v13 = vpop.f32.mrb[1].mxu0 }
 0x11e   :  { %v133_v14 = vmax.f32 %v130_v12, 0.0 }
 0x120   :  { %548 = vmatmul.mubr.f32.vlgmr.msra.gmra.mrb[0].mxu1 %v133_v14 }
 0x121   :  { %617 = vmatprep.mubr.msk.f32.mxu1 %vm776_vm0, %v777_v1  ;;  %694 = vmatpush3.bf16.msra.mxu1 %v693_v21  ;;  %v320_v1 = vld [vmem:[#allocation4 + $0x130] sm:$0xff] }
 0x122   :  { %695 = vmatprep.subr.bf16.mxu1 %v775_v0  ;;  %v702_v28 = vpack.c.bf16 %v321_v27, %v320_v1 }
 0x125   :  { %697 = vmatpush3.bf16.msra.mxu1 %v696_v23 }
 0x126   :  { %698 = vmatprep.subr.bf16.mxu1 %v775_v0 }
 0x129   :  { %700 = vmatpush3.bf16.msra.mxu1 %v699_v26 }
 0x12a   :  { %701 = vmatprep.subr.bf16.mxu1 %v775_v0 }
 0x12d   :  { %703 = vmatpush3.bf16.msra.mxu1 %v702_v28 }
 0x12e   :  { %704 = vmatprep.subr.bf16.mxu1 %v775_v0 }
 0x131   :  { %706 = vmatpush3.bf16.msra.mxu1 %v705_v31 }
 0x132   :  { %707 = vmatprep.subr.bf16.mxu1 %v775_v0 }
 0x135   :  { %709 = vmatpush3.bf16.msra.mxu1 %v708_v34 }
 0x136   :  { %710 = vmatprep.subr.bf16.mxu1 %v775_v0 }
 0x139   :  { %712 = vmatpush3.bf16.msra.mxu1 %v711_v37 }
 0x13a   :  { %713 = vmatprep.subr.bf16.mxu1 %v775_v0 }
 0x13d   :  { %715 = vmatpush3.bf16.msra.mxu1 %v714_v45 }
 0x1f3   :  { %v218_v39 = vpop.f32.mrb[0].mxu1 }
 0x1f4   :  { %v219_v40 = vadd.f32 %v409_v38, %v218_v39  ;;  %v549_v41 = vpop.f32.mrb[1].mxu1 }
 0x1f6   :  { %v222_v42 = vmax.f32 %v219_v40, 0.0 }
 0x1f8   :  { %583 = vmatmul.mubr.f32.vlgmr.msra.gmra.mrb[2].mxu0 %v222_v42 }
 0x2cb   :  { %v308_v47 = vpop.f32.mrb[2].mxu0 }
 0x2cc   :  { %v309_v48 = vadd.f32 %v410_v46, %v308_v47  ;;  %v584_v0 = vpop.f32.mrb[3].mxu0 }
 0x2ce   :  { %v312_v49 = vmax.f32 %v309_v48, 0.0 }
 0x2d0   :  { %618 = vmatmul.mubr.f32.vlgmr.msra.gmra.mrb[2].mxu1 %v312_v49 }
 0x3a3   :  { %v398_v51 = vpop.f32.mrb[2].mxu1 }
 0x3a4   :  { %v399_v52 = vadd.f32 %v411_v50, %v398_v51  ;;  %v619_v53 = vpop.f32.mrb[3].mxu1 }
 0x3a6   :  { %402 = vst [vmem:[%s889_s4] sm:$0xff] %v399_v52 }
 0x3a7   :  { %407 = vsyncpa [#allocation3], 1 }
 0x3a8   :  { %408 = vsyncpa [#allocation5], 1 }

</bundles_post_ra>
